<compile_context>
chip_gen: v5e
topology: v5e:2x2
jax: 0.10.0
libtpu: 0.0.40
codegen_flags: <defaults>
</compile_context>

<pallas_src>
import math

import jax
import jax.numpy as jnp
from jax.experimental import pallas as pl
from jax.experimental.pallas import tpu as pltpu


# ----------------------------------------------------------------------------
# helpers
# ----------------------------------------------------------------------------
def _round_up(x: int, m: int) -> int:
    return ((x + m - 1) // m) * m


def _cdiv(a: int, b: int) -> int:
    return (a + b - 1) // b


def _interp_matrix(n_in: int, n_out: int) -> jnp.ndarray:
    """1-D linear interpolation matrix (n_out, n_in), align_corners=True."""
    if n_out == 1:
        return jnp.zeros((1, n_in), dtype=jnp.float32).at[0, 0].set(1.0)
    scale = (n_in - 1) / (n_out - 1)
    src = jnp.arange(n_out, dtype=jnp.float32) * scale
    lo = jnp.clip(jnp.floor(src).astype(jnp.int32), 0, n_in - 1)
    hi = jnp.clip(lo + 1, 0, n_in - 1)
    frac = src - lo.astype(jnp.float32)
    rows = jnp.arange(n_out)
    mat = jnp.zeros((n_out, n_in), dtype=jnp.float32)
    mat = mat.at[rows, lo].add(1.0 - frac)
    mat = mat.at[rows, hi].add(frac)
    return mat


def _vmem_plan():
    """Generation-aware (tile budget, hard vmem_limit cap) in bytes."""
    cap_bytes = 128 * 2**20
    try:
        info = pltpu.get_tpu_info()
        cap_bytes = int(getattr(info, "vmem_capacity_bytes", cap_bytes))
    except Exception:
        pass
    if cap_bytes <= 64 * 2**20:          # v7x-class: 64 MiB per TensorCore
        budget, hard_cap = 44 * 2**20, 56 * 2**20
    else:                                 # v5e / v6e: 128 MiB
        budget, hard_cap = 96 * 2**20, 110 * 2**20
    budget = min(budget, int(cap_bytes * 0.70))
    hard_cap = min(hard_cap, int(cap_bytes * 0.88))
    return budget, hard_cap


def _plan_tiles(B, H_in, W_in, H_out, W_lane, in_isz, w_isz, out_isz, sub,
                budget_bytes):
    """Pick (TB planes/step, TH output rows/step) under a VMEM budget."""

    def step_bytes(tb, th):
        x_blk = tb * H_in * W_in * in_isz          # double-buffered input block
        o_blk = tb * th * W_lane * out_isz         # double-buffered output block
        ah = th * H_in * w_isz                     # A_h strip
        awt = W_in * W_lane * w_isz                # A_w^T (constant block)
        wp = tb * H_in * W_lane * w_isz            # scratch: single-buffered
        tmp = tb * H_in * W_lane * 4               # f32 W-pass intermediate
        return 2 * (x_blk + o_blk + ah + awt) + wp + tmp

    # ---- output-row strip TH ----
    if step_bytes(1, H_out) <= budget_bytes:
        th = H_out                      # whole plane in one strip: no padding
    else:
        # Largest multiple of `sub` that fits with a single plane.
        # TODO(synk): if even (1, sub) does not fit, the plane itself is too
        # big for this dense formulation; needs the banded/windowed variant.
        th_max = sub
        t = 2 * sub
        while t < H_out and step_bytes(1, t) <= budget_bytes:
            th_max = t
            t += sub
        th = th_max
        # Prefer a divisor of H_out (H_pad == H_out -> no output padding),
        # unless it would shrink the strip by more than 2x.
        lo = max(sub, th_max // 2)
        for cand in range(th_max, lo - 1, -sub):
            if H_out % cand == 0:
                th = cand
                break

    # ---- planes per grid step TB (divisor of B -> no batch padding) ----
    tb = 1
    for cand in range(min(B, 16), 0, -1):
        if B % cand == 0 and step_bytes(cand, th) <= budget_bytes:
            tb = cand
            break

    # Keep >= 2 grid steps so the pipeline / both v7x TensorCores have work.
    n_h = _cdiv(_round_up(H_out, th), th)
    while tb > 1 and (B // tb) * n_h < 2:
        nxt = 1
        for cand in range(tb - 1, 0, -1):
            if B % cand == 0:
                nxt = cand
                break
        tb = nxt

    return tb, th, step_bytes(tb, th)


# ----------------------------------------------------------------------------
# kernel
# ----------------------------------------------------------------------------
def _interp_kernel(ah_ref, awt_ref, x_ref, o_ref, wp_ref):
    # ah_ref : (TH, H_in)        row strip of A_h for this output-row tile
    # awt_ref: (W_in, W_lane)    A_w^T, pre-transposed + lane-padded
    # x_ref  : (TB, H_in, W_in)  batch of input planes (constant across h)
    # o_ref  : (TB, TH, W_lane)  batch of output row-strips
    # wp_ref : (TB, H_in, W_lane) VMEM scratch: cached W-pass result
    tb, h_in, w_in = x_ref.shape

    # ---- W pass: once per plane batch (h == 0), cached in VMEM scratch ----
    @pl.when(pl.program_id(1) == 0)
    def _():
        awt = awt_ref[...]
        x_sub = 8 * max(1, 4 // jnp.dtype(x_ref.dtype).itemsize)
        if h_in % x_sub == 0:
            # One big lane-dense MXU matmul over all planes.
            x2d = x_ref[...].reshape(tb * h_in, w_in)
            tmp = jnp.dot(x2d, awt, preferred_element_type=jnp.float32)
            for b in range(tb):          # per-slice cast into scratch
                wp_ref[b] = tmp[b * h_in:(b + 1) * h_in, :].astype(wp_ref.dtype)
        else:
            # Fallback: per-plane (avoids a sublane-crossing reshape).
            for b in range(tb):
                wp_ref[b] = jnp.dot(x_ref[b], awt,
                                    preferred_element_type=jnp.float32
                                    ).astype(wp_ref.dtype)

    # ---- H pass: per-plane, lane-dense, reads the cached W-pass result ----
    ah = ah_ref[...]
    for b in range(tb):
        o_ref[b] = jnp.dot(ah, wp_ref[b],
                           preferred_element_type=jnp.float32
                           ).astype(o_ref.dtype)


# ----------------------------------------------------------------------------
# wrapper
# ----------------------------------------------------------------------------
def interpolate_bilinear(x: jnp.ndarray, scale_factor,
                         _budget_override=None) -> jnp.ndarray:
    """Bilinear upsampling, align_corners=True, NCHW in / NCHW out."""
    N, C, H_in, W_in = x.shape
    if isinstance(scale_factor, (tuple, list)):
        sh, sw = scale_factor
    else:
        sh = sw = scale_factor
    # PyTorch computes output size as floor(in * scale_factor).
    H_out = int(math.floor(H_in * float(sh)))
    W_out = int(math.floor(W_in * float(sw)))

    # bf16 inputs -> bf16 x bf16 -> f32 MXU path; otherwise full f32.
    compute_dtype = jnp.bfloat16 if x.dtype == jnp.bfloat16 else jnp.float32
    w_isz = jnp.dtype(compute_dtype).itemsize
    in_isz = jnp.dtype(x.dtype).itemsize
    out_isz = in_isz

    # Lane-dense output width: round W_out up to a multiple of 128.
    W_lane = _round_up(W_out, 128)

    # Sublane granularity for the output / weight dtype (f32: 8, bf16: 16).
    sub = max(8 * max(1, 4 // out_isz), 8 * max(1, 4 // w_isz))

    B = N * C
    budget, hard_cap = _vmem_plan()
    if _budget_override is not None:
        budget = int(_budget_override)
    TB, TH, step_bytes = _plan_tiles(B, H_in, W_in, H_out, W_lane,
                                     in_isz, w_isz, out_isz, sub, budget)
    B_pad = _round_up(B, TB)          # TB divides B -> normally B_pad == B
    H_pad = _round_up(H_out, TH)

    # 1-D interpolation weights (built once, outside the kernel).
    a_h = _interp_matrix(H_in, H_out).astype(compute_dtype)      # (H_out, H_in)
    if H_pad > H_out:
        a_h = jnp.pad(a_h, ((0, H_pad - H_out), (0, 0)))
    a_wT = _interp_matrix(W_in, W_out).T.astype(compute_dtype)   # (W_in, W_out)
    if W_lane > W_out:
        a_wT = jnp.pad(a_wT, ((0, 0), (0, W_lane - W_out)))

    x_flat = x.reshape(B, H_in, W_in)
    if B_pad > B:
        x_flat = jnp.pad(x_flat, ((0, B_pad - B), (0, 0), (0, 0)))

    # step_bytes already counts the double-buffer factor -> ~1.25x headroom.
    vmem_limit = int(min(hard_cap, max(1.25 * step_bytes, 24 * 2**20)))

    out_pad = pl.pallas_call(
        _interp_kernel,
        out_shape=jax.ShapeDtypeStruct((B_pad, H_pad, W_lane), x.dtype),
        grid_spec=pltpu.PrefetchScalarGridSpec(
            num_scalar_prefetch=0,
            grid=(B_pad // TB, H_pad // TH),
            in_specs=[
                pl.BlockSpec((TH, H_in), lambda b, h: (h, 0)),
                pl.BlockSpec((W_in, W_lane), lambda b, h: (0, 0)),
                pl.BlockSpec((TB, H_in, W_in), lambda b, h: (b, 0, 0)),
            ],
            out_specs=pl.BlockSpec((TB, TH, W_lane), lambda b, h: (b, h, 0)),
            scratch_shapes=[pltpu.VMEM((TB, H_in, W_lane), compute_dtype)],
        ),
        compiler_params=pltpu.CompilerParams(
            # h axis must be sequential ("arbitrary") so the scratch W-pass
            # cache is valid across output-row strips of the same plane batch.
            dimension_semantics=("parallel", "arbitrary"),
            vmem_limit_bytes=vmem_limit),
    )(a_h, a_wT, x_flat)

    if B_pad > B or H_pad > H_out or W_lane > W_out:
        out_pad = out_pad[:B, :H_out, :W_out]
    return out_pad.reshape(N, C, H_out, W_out)


# ----------------------------------------------------------------------------
# test
# ----------------------------------------------------------------------------
if __name__ == "__main__":
    key = jax.random.PRNGKey(0)
    N, C, H, W = 2, 4, 16, 16
    scale_factor = 2  # Interpolate(scale_factor=2, mode='bilinear')

    x = jax.random.normal(key, (N, C, H, W), dtype=jnp.float32)

    # Pure-JAX reference of the same separable formulation.
    a_h = _interp_matrix(H, H * scale_factor)
    a_w = _interp_matrix(W, W * scale_factor)
    ref = jnp.einsum("oh,nchw,pw->ncop", a_h, x, a_w)

    # 1) Default planning (whole plane per strip, TH == H_out).
    out = interpolate_bilinear(x, scale_factor)
    out = jax.block_until_ready(out)
    assert out.shape == (N, C, H * scale_factor, W * scale_factor)
    assert jnp.allclose(out, ref, atol=1e-4, rtol=1e-4)

    # 2) Tiny artificial budget -> TH < H_out, exercises the cached-W-pass
    #    (@pl.when) path and scratch reuse across h steps.
    out2 = interpolate_bilinear(x, scale_factor, _budget_override=64 * 1024)
    out2 = jax.block_until_ready(out2)
    assert out2.shape == (N, C, H * scale_factor, W * scale_factor)
    assert jnp.allclose(out2, ref, atol=1e-4, rtol=1e-4)

    print("KERNEL_OK")
</pallas_src>

<mosaic_0001>
module attributes {stable_mosaic.version = 11 : i64} {
  func.func @_interp_kernel(%arg0: i32, %arg1: i32, %arg2: memref<32x16xf32, #tpu.memory_space<vmem>>, %arg3: memref<16x128xf32, #tpu.memory_space<vmem>>, %arg4: memref<4x16x16xf32, #tpu.memory_space<vmem>>, %arg5: memref<4x32x128xf32, #tpu.memory_space<vmem>>, %arg6: memref<4x16x128xf32, #tpu.memory_space<vmem>>) attributes {dimension_semantics = [#tpu.dimension_semantics<parallel>, #tpu.dimension_semantics<arbitrary>], iteration_bounds = array<i64: 2, 1>, scalar_prefetch = 0 : i64, scratch_operands = 1 : i64, tpu.core_type = #tpu.core_type<tc>, window_params = [{transform_indices = @transform_0, window_bounds = array<i64: 32, 16>}, {pipeline_mode = #tpu.pipeline_mode<synchronous>, transform_indices = @transform_1, window_bounds = array<i64: 16, 128>}, {transform_indices = @transform_2, window_bounds = array<i64: 4, 16, 16>}, {transform_indices = @transform_3, window_bounds = array<i64: 4, 32, 128>}]} {
    %c0_i32 = arith.constant 0 : i32
    %0 = arith.cmpi eq, %arg1, %c0_i32 : i32
    %1 = arith.extui %0 : i1 to i32
    %c0_i32_0 = arith.constant 0 : i32
    %2 = arith.cmpi ne, %1, %c0_i32_0 : i32
    scf.if %2 {
      %c0_26 = arith.constant 0 : index
      %c0_27 = arith.constant 0 : index
      %28 = vector.load %arg3[%c0_26, %c0_27] : memref<16x128xf32, #tpu.memory_space<vmem>>, vector<16x128xf32>
      %c0_28 = arith.constant 0 : index
      %c0_29 = arith.constant 0 : index
      %c0_30 = arith.constant 0 : index
      %29 = vector.load %arg4[%c0_28, %c0_29, %c0_30] : memref<4x16x16xf32, #tpu.memory_space<vmem>>, vector<4x16x16xf32>
      %30 = vector.shape_cast %29 : vector<4x16x16xf32> to vector<64x16xf32>
      %cst_31 = arith.constant dense<0.000000e+00> : vector<64x128xf32>
      %31 = tpu.matmul %30, %28, %cst_31 {dimension_numbers = #tpu.dot_dimension_numbers<[1], [0], [0], [1], [0, 0, 1, 1], [], []>} : vector<64x16xf32>, vector<16x128xf32>, vector<64x128xf32> -> vector<64x128xf32>
      %32 = vector.extract_strided_slice %31 {offsets = [0, 0], sizes = [16, 128], strides = [1, 1]} : vector<64x128xf32> to vector<16x128xf32>
      %c0_32 = arith.constant 0 : index
      %c0_33 = arith.constant 0 : index
      %c0_34 = arith.constant 0 : index
      %33 = vector.load %arg6[%c0_32, %c0_33, %c0_34] : memref<4x16x128xf32, #tpu.memory_space<vmem>>, vector<1x16x128xf32>
      %34 = vector.shape_cast %33 : vector<1x16x128xf32> to vector<16x128xf32>
      %35 = vector.shape_cast %32 : vector<16x128xf32> to vector<1x16x128xf32>
      tpu.vector_store %arg6[%c0_32, %c0_33, %c0_34], %35 {strides = array<i32>} : memref<4x16x128xf32, #tpu.memory_space<vmem>>, vector<1x16x128xf32>,
      %36 = vector.extract_strided_slice %31 {offsets = [16, 0], sizes = [16, 128], strides = [1, 1]} : vector<64x128xf32> to vector<16x128xf32>
      %c1_35 = arith.constant 1 : index
      %c0_36 = arith.constant 0 : index
      %c0_37 = arith.constant 0 : index
      %37 = vector.load %arg6[%c1_35, %c0_36, %c0_37] : memref<4x16x128xf32, #tpu.memory_space<vmem>>, vector<1x16x128xf32>
      %38 = vector.shape_cast %37 : vector<1x16x128xf32> to vector<16x128xf32>
      %39 = vector.shape_cast %36 : vector<16x128xf32> to vector<1x16x128xf32>
      tpu.vector_store %arg6[%c1_35, %c0_36, %c0_37], %39 {strides = array<i32>} : memref<4x16x128xf32, #tpu.memory_space<vmem>>, vector<1x16x128xf32>,
      %40 = vector.extract_strided_slice %31 {offsets = [32, 0], sizes = [16, 128], strides = [1, 1]} : vector<64x128xf32> to vector<16x128xf32>
      %c2_38 = arith.constant 2 : index
      %c0_39 = arith.constant 0 : index
      %c0_40 = arith.constant 0 : index
      %41 = vector.load %arg6[%c2_38, %c0_39, %c0_40] : memref<4x16x128xf32, #tpu.memory_space<vmem>>, vector<1x16x128xf32>
      %42 = vector.shape_cast %41 : vector<1x16x128xf32> to vector<16x128xf32>
      %43 = vector.shape_cast %40 : vector<16x128xf32> to vector<1x16x128xf32>
      tpu.vector_store %arg6[%c2_38, %c0_39, %c0_40], %43 {strides = array<i32>} : memref<4x16x128xf32, #tpu.memory_space<vmem>>, vector<1x16x128xf32>,
      %44 = vector.extract_strided_slice %31 {offsets = [48, 0], sizes = [16, 128], strides = [1, 1]} : vector<64x128xf32> to vector<16x128xf32>
      %c3_41 = arith.constant 3 : index
      %c0_42 = arith.constant 0 : index
      %c0_43 = arith.constant 0 : index
      %45 = vector.load %arg6[%c3_41, %c0_42, %c0_43] : memref<4x16x128xf32, #tpu.memory_space<vmem>>, vector<1x16x128xf32>
      %46 = vector.shape_cast %45 : vector<1x16x128xf32> to vector<16x128xf32>
      %47 = vector.shape_cast %44 : vector<16x128xf32> to vector<1x16x128xf32>
      tpu.vector_store %arg6[%c3_41, %c0_42, %c0_43], %47 {strides = array<i32>} : memref<4x16x128xf32, #tpu.memory_space<vmem>>, vector<1x16x128xf32>,
    } else {
    }
    %c0 = arith.constant 0 : index
    %c0_1 = arith.constant 0 : index
    %3 = vector.load %arg2[%c0, %c0_1] : memref<32x16xf32, #tpu.memory_space<vmem>>, vector<32x16xf32>
    %c0_2 = arith.constant 0 : index
    %c0_3 = arith.constant 0 : index
    %c0_4 = arith.constant 0 : index
    %4 = vector.load %arg6[%c0_2, %c0_3, %c0_4] : memref<4x16x128xf32, #tpu.memory_space<vmem>>, vector<1x16x128xf32>
    %5 = vector.shape_cast %4 : vector<1x16x128xf32> to vector<16x128xf32>
    %cst = arith.constant dense<0.000000e+00> : vector<32x128xf32>
    %6 = tpu.matmul %3, %5, %cst {dimension_numbers = #tpu.dot_dimension_numbers<[1], [0], [0], [1], [0, 0, 1, 1], [], []>} : vector<32x16xf32>, vector<16x128xf32>, vector<32x128xf32> -> vector<32x128xf32>
    %c0_5 = arith.constant 0 : index
    %c0_6 = arith.constant 0 : index
    %c0_7 = arith.constant 0 : index
    %7 = vector.load %arg5[%c0_5, %c0_6, %c0_7] : memref<4x32x128xf32, #tpu.memory_space<vmem>>, vector<1x32x128xf32>
    %8 = vector.shape_cast %7 : vector<1x32x128xf32> to vector<32x128xf32>
    %9 = vector.shape_cast %6 : vector<32x128xf32> to vector<1x32x128xf32>
    tpu.vector_store %arg5[%c0_5, %c0_6, %c0_7], %9 {strides = array<i32>} : memref<4x32x128xf32, #tpu.memory_space<vmem>>, vector<1x32x128xf32>,
    %c1 = arith.constant 1 : index
    %c0_8 = arith.constant 0 : index
    %c0_9 = arith.constant 0 : index
    %10 = vector.load %arg6[%c1, %c0_8, %c0_9] : memref<4x16x128xf32, #tpu.memory_space<vmem>>, vector<1x16x128xf32>
    %11 = vector.shape_cast %10 : vector<1x16x128xf32> to vector<16x128xf32>
    %cst_10 = arith.constant dense<0.000000e+00> : vector<32x128xf32>
    %12 = tpu.matmul %3, %11, %cst_10 {dimension_numbers = #tpu.dot_dimension_numbers<[1], [0], [0], [1], [0, 0, 1, 1], [], []>} : vector<32x16xf32>, vector<16x128xf32>, vector<32x128xf32> -> vector<32x128xf32>
    %c1_11 = arith.constant 1 : index
    %c0_12 = arith.constant 0 : index
    %c0_13 = arith.constant 0 : index
    %13 = vector.load %arg5[%c1_11, %c0_12, %c0_13] : memref<4x32x128xf32, #tpu.memory_space<vmem>>, vector<1x32x128xf32>
    %14 = vector.shape_cast %13 : vector<1x32x128xf32> to vector<32x128xf32>
    %15 = vector.shape_cast %12 : vector<32x128xf32> to vector<1x32x128xf32>
    tpu.vector_store %arg5[%c1_11, %c0_12, %c0_13], %15 {strides = array<i32>} : memref<4x32x128xf32, #tpu.memory_space<vmem>>, vector<1x32x128xf32>,
    %c2 = arith.constant 2 : index
    %c0_14 = arith.constant 0 : index
    %c0_15 = arith.constant 0 : index
    %16 = vector.load %arg6[%c2, %c0_14, %c0_15] : memref<4x16x128xf32, #tpu.memory_space<vmem>>, vector<1x16x128xf32>
    %17 = vector.shape_cast %16 : vector<1x16x128xf32> to vector<16x128xf32>
    %cst_16 = arith.constant dense<0.000000e+00> : vector<32x128xf32>
    %18 = tpu.matmul %3, %17, %cst_16 {dimension_numbers = #tpu.dot_dimension_numbers<[1], [0], [0], [1], [0, 0, 1, 1], [], []>} : vector<32x16xf32>, vector<16x128xf32>, vector<32x128xf32> -> vector<32x128xf32>
    %c2_17 = arith.constant 2 : index
    %c0_18 = arith.constant 0 : index
    %c0_19 = arith.constant 0 : index
    %19 = vector.load %arg5[%c2_17, %c0_18, %c0_19] : memref<4x32x128xf32, #tpu.memory_space<vmem>>, vector<1x32x128xf32>
    %20 = vector.shape_cast %19 : vector<1x32x128xf32> to vector<32x128xf32>
    %21 = vector.shape_cast %18 : vector<32x128xf32> to vector<1x32x128xf32>
    tpu.vector_store %arg5[%c2_17, %c0_18, %c0_19], %21 {strides = array<i32>} : memref<4x32x128xf32, #tpu.memory_space<vmem>>, vector<1x32x128xf32>,
    %c3 = arith.constant 3 : index
    %c0_20 = arith.constant 0 : index
    %c0_21 = arith.constant 0 : index
    %22 = vector.load %arg6[%c3, %c0_20, %c0_21] : memref<4x16x128xf32, #tpu.memory_space<vmem>>, vector<1x16x128xf32>
    %23 = vector.shape_cast %22 : vector<1x16x128xf32> to vector<16x128xf32>
    %cst_22 = arith.constant dense<0.000000e+00> : vector<32x128xf32>
    %24 = tpu.matmul %3, %23, %cst_22 {dimension_numbers = #tpu.dot_dimension_numbers<[1], [0], [0], [1], [0, 0, 1, 1], [], []>} : vector<32x16xf32>, vector<16x128xf32>, vector<32x128xf32> -> vector<32x128xf32>
    %c3_23 = arith.constant 3 : index
    %c0_24 = arith.constant 0 : index
    %c0_25 = arith.constant 0 : index
    %25 = vector.load %arg5[%c3_23, %c0_24, %c0_25] : memref<4x32x128xf32, #tpu.memory_space<vmem>>, vector<1x32x128xf32>
    %26 = vector.shape_cast %25 : vector<1x32x128xf32> to vector<32x128xf32>
    %27 = vector.shape_cast %24 : vector<32x128xf32> to vector<1x32x128xf32>
    tpu.vector_store %arg5[%c3_23, %c0_24, %c0_25], %27 {strides = array<i32>} : memref<4x32x128xf32, #tpu.memory_space<vmem>>, vector<1x32x128xf32>,
    return
  }
  func.func @transform_0(%arg0: i32, %arg1: i32) -> (i32, i32) {
    %c0_i32 = arith.constant 0 : i32
    %c0_i32_0 = arith.constant 0 : i32
    return %arg1, %c0_i32 : i32, i32
  }
  func.func @transform_1(%arg0: i32, %arg1: i32) -> (i32, i32) {
    %c0_i32 = arith.constant 0 : i32
    %c0_i32_0 = arith.constant 0 : i32
    %c0_i32_1 = arith.constant 0 : i32
    return %c0_i32, %c0_i32_0 : i32, i32
  }
  func.func @transform_2(%arg0: i32, %arg1: i32) -> (i32, i32, i32) {
    %c0_i32 = arith.constant 0 : i32
    %c0_i32_0 = arith.constant 0 : i32
    %c0_i32_1 = arith.constant 0 : i32
    return %arg0, %c0_i32, %c0_i32_0 : i32, i32, i32
  }
  func.func @transform_3(%arg0: i32, %arg1: i32) -> (i32, i32, i32) {
    %c0_i32 = arith.constant 0 : i32
    %c0_i32_0 = arith.constant 0 : i32
    return %arg0, %arg1, %c0_i32 : i32, i32, i32
  }
}

</mosaic_0001>

<bundles_post_ra>
// kernel: tpu_custom_call.1
= control target key start
LH: loop header
LB: loop body
LE: loop exit
PB: predicated region body
PF: predicated region fallthrough
CT: control target
= control target key end

     0   :  { %8 = vsyncpa [#allocation4], 0  ;;  %s1051_s0 = inlined_call_operand.vmem [shape: f32[32,16], index: 0, kind: input, shape index: {}]   ;;  %s1052_s1 = inlined_call_operand.vmem [shape: f32[16,128], index: 1, kind: input, shape index: {}]   ;;  %s1053_s2 = inlined_call_operand.hbm [shape: f32[8,16,16], index: 2, kind: input, shape index: {}]   ;;  %s1054_s3 = inlined_call_operand.hbm [shape: f32[8,32,128], index: 3, kind: output, shape index: {}]  }
   0x1   :  { %10 = vsyncpa [#allocation4 + $0x1], 0 }
   0x2   :  { %11 = vsyncpa [#allocation5], 0 }
   0x3   :  { %13 = vsyncpa [#allocation5 + $0x1], 0  ;;  %s869_s12 = smov 0   ;;  %s871_s13 = smov 0  }
   0x4   :  { %s873_s14 = smov 0   ;;  %s875_s15 = smov 0  }
   0x5   :  { %s877_s16 = smov 0   ;;  %s879_s17 = smov 0  }
   0x6 LB: > { %s603_s18 = sadd.s32 4294967295, %s843_s17   ;;  %s604_s19 = sadd.s32 4294967294, %s843_s17   ;;  %s843_s17 = sphi %s879_s17, %s19_s17   ;;  %s839_s16 = sphi %s877_s16, %s1063_s16   ;;  %s835_s15 = sphi %s875_s15, %s1062_s15   ;;  %s831_s14 = sphi %s873_s14, %s1061_s14   ;;  %s827_s13 = sphi %s871_s13, %s1060_s13   ;;  %s823_s12 = sphi %s869_s12, %s1059_s12  }
   0x7   : > { %s31_s20 = sadd.s32 1, %s839_s16  ;;  %s85_s21 = sadd.s32 1, %s831_s14 }
   0x8   : > { %p33_p0 = scmp.ge.s32.totalorder %s31_s20, 2  ;;  %p92_p1 = scmp.ne.s32.totalorder %s831_s14, %s827_s13 }
   0x9   : > { %p93_p2 = scmp.eq.s32.totalorder %s843_s17, 0  ;;  %p98_p3 = scmp.ne.s32.totalorder %s827_s13, %s823_s12 }
   0xa   : > { %s1065_s20 = smov (%p33_p0, %s31_s20), 0  ;;  %p99_p5 = scmp.eq.s32.totalorder %s603_s18, 0 }
   0xb   : > { %p910_p4 = por %p93_p2, %p92_p1  ;;  %s82_s23 = ssub.s32 %s839_s16, %s1065_s20 }
   0xc   : > { %p124_p6 = scmp.eq.s32.totalorder %s603_s18, 1  ;;  %p83_p7 = scmp.eq.s32.totalorder %s82_s23, 0 }
   0xd   : > { %p916_p8 = por %p99_p5, %p98_p3  ;;  %p130_p10 = scmp.eq.s32.totalorder %s604_s19, 1 }
   0xe   : > { %p920_p9 = por %p124_p6, %p92_p1  ;;  %p607_p12 = scmp.ge.s32.totalorder %s843_s17, 2 }
   0xf   : > { %s925_s26 = scalar_select %p83_p7, %s831_s14, %s85_s21  }
  0x10   : > { %p927_p11 = por %p130_p10, %p98_p3  ;;  %p677_p13 = scmp.lt.s32.totalorder %s843_s17, 2 }
  0x11   : > { %s162_s28 = sand.u32 1, %s831_s14   ;;  %s658_s30 = sshll.u32 %s839_s16, 6 }
  0x12   : > { %s608_s29 = sshll.u32 %s162_s28, 6  ;;  %s172_s6 = scalar_lea.hbm %s1053_s2, %s658_s30 }
  0x13   : > { %s166_s7 = scalar_lea.vmem [#allocation3], %s608_s29  ;;  %s173_s9 = sshll.u32 %s172_s6, 4  ;;  %s174_s9 = int_to_ptr.hbm [resolvable:$true] %s173_s9 }
  0x14   : > { %s175_s8 = sshll.u32 %s166_s7, 4  ;;  %p670_p0 = pnand %p677_p13, %p910_p4  ;;  %s176_s8 = int_to_ptr.vmem [resolvable:$true] %s175_s8 }
  0x15   : > { %p612_p1 = scmp.ge.s32.totalorder %s843_s17, 1  ;;  %s163_s10 = scalar_lea.sflag [#allocation4], %s162_s28 }
  0x16   : > { %s845_s11 = smov 128   ;;  %s846_s18 = smov 8  }
  0x17   : > { %672 = dma.hbm_to_vmem [thread:$0]  (!%p670_p0), %s174_s9, 1024, %s176_s8, %s163_s10, %s845_s11, %s845_s11, %s846_s18  }
  0x18   : > { %p183_p2 = scmp.lt.s32.totalorder %s843_s17, 3 }
  0x1a   : > { %p184_p3 = pnand %p612_p1, %p183_p2 }
  0x1b   : > { %s943_s19 = sand.u32 (!%p184_p3), 1, %s827_s13  }
  0x1c   : > { %187 = sbr.rel (%p184_p3) target bundleno = 367 (0x16f), region = 32  ;;  %s613_s21 = sshll.u32 (!%p184_p3), %s943_s19, 6 }
  0x1d   : > { %s190_s23 = scalar_lea.sflag (!%p184_p3), [#allocation4], %s943_s19  ;;  %s193_s29 = scalar_lea.vmem (!%p184_p3), [#allocation3], %s613_s21 }
  0x21   : > { %814 = dma.done.wait (%p916_p8), %s190_s23, 1024  }
  0x22   : > { %816 = vsyncadd (%p916_p8), %s190_s23, 4294966272  ;;  %v236_v0 = vld [vmem:[%s1052_s1 + $0x8] sm:$0xff]  ;;  %v235_v1 = vld [vmem:[%s1052_s1] sm:$0xff]  ;;  %vm245_vm0 = vcmask 130048   ;;  %s614_s18 = sshll.u32 %s943_s19, 7  ;;  %s660_s23 = sshll.u32 %s835_s15, 7 }
  0x23   : > { %284 = vmatpush.msra.mxu0 %v236_v0  ;;  %v237_v2 = vld [vmem:[%s193_s29] sm:$0xff]  ;;  %661 = vmatpush.msra.mxu2 %v236_v0  ;;  %v243_v3 = vld [vmem:[%s193_s29 + $0x30] sm:$0xff]  ;;  %v238_v4 = vld [vmem:[%s193_s29 + $0x8] sm:$0xff]  ;;  %s994_s21 = scalar_lea.vmem [#allocation6], %s614_s18  ;;  %s500_s28 = scalar_lea.hbm %s1054_s3, %s660_s23 }
  0x24   : > { %v244_v5 = vld [vmem:[%s193_s29 + $0x38] sm:$0xff]  ;;  %v239_v6 = vld [vmem:[%s193_s29 + $0x10] sm:$0xff]  ;;  %v241_v8 = vld [vmem:[%s193_s29 + $0x20] sm:$0xff]  ;;  %s501_s30 = sshll.u32 %s994_s21, 4  ;;  %s503_s4 = sshll.u32 %s500_s28, 4  ;;  %s502_s30 = int_to_ptr.vmem [resolvable:$true] %s501_s30  ;;  %s504_s4 = int_to_ptr.hbm [resolvable:$true] %s503_s4 }
  0x25   : > { %285 = vmatpush.msra.mxu0 %v235_v1  ;;  %662 = vmatpush.msra.mxu2 %v235_v1  ;;  %v240_v7 = vld [vmem:[%s193_s29 + $0x18] sm:$0xff]  ;;  %v242_v9 = vld [vmem:[%s193_s29 + $0x28] sm:$0xff]  ;;  %v324_v13 = vld [vmem:[%s1051_s0 + $0x10] sm:$0xff]  ;;  %s486_s24 = scalar_lea.sflag [#allocation5], %s943_s19  ;;  %s775_s5 = sshra.s32 %s504_s4, 4  ;;  %s776_s5 = int_to_ptr.hbm [resolvable:$true] %s775_s5 }
  0x26   : > { %615 = vmatmul.msk.f32.vlgmr.msra.gmra.mxu0 %vm245_vm0, %v237_v2  ;;  %621 = vmatmul.msk.f32.vlgmr.msra.gmra.mxu2 %vm245_vm0, %v243_v3  ;;  %v322_v14 = vld [vmem:[%s1051_s0] sm:$0xff]  ;;  %v325_v17 = vld [vmem:[%s1051_s0 + $0x18] sm:$0xff]  ;;  %v323_v18 = vld [vmem:[%s1051_s0 + $0x8] sm:$0xff]  ;;  %s777_s6 = scalar_lea.hbm %s776_s5, 128  ;;  %s781_s8 = scalar_lea.hbm %s1054_s3, 256 }
  0x27   : > { %p778_p4 = scmp.ne.s32.totalorder %s776_s5, %s777_s6  ;;  %p782_p7 = scmp.lt.s32.totalorder %s776_s5, %s1054_s3 }
  0x28   : > { %p783_p8 = scmp.lt.s32.totalorder %s781_s8, %s777_s6 }
  0x29   : > { %p779_p5 = pnand %p778_p4, %p920_p9 }
  0x2a   : > { %p784_p10 = por %p783_p8, %p782_p7 }
  0x2b   : > { %p780_p6 = pneg %p779_p5 }
  0x2d   : > { %p785_p13 = pnand %p784_p10, %p780_p6 }
  0x2e   : > { %616 = vmatmul.msk.f32.gmra.mxu0 %vm245_vm0, %v238_v4  ;;  %622 = vmatmul.msk.f32.gmra.mxu2 %vm245_vm0, %v244_v5 }
  0x36   : > { %617 = vmatmul.msk.f32.gmra.mxu0 %vm245_vm0, %v239_v6 }
  0x3e   : > { %618 = vmatmul.msk.f32.gmra.mxu0 %vm245_vm0, %v240_v7 }
  0x46   : > { %619 = vmatmul.msk.f32.gmra.mxu0 %vm245_vm0, %v241_v8 }
  0x4e   : > { %620 = vmatmul.msk.f32.gmra.mxu0 %vm245_vm0, %v242_v9 }
  0xa3   : > { %v287_v10 = vpop.f32.mrf.mxu0 }
  0xa9   : > { %v305_v11 = vpop.f32.mrf.mxu2 }
  0xab   : > { %v290_v12 = vpop.f32.mrf.mxu0 }
  0xac   : > { %355 = vmatpush.msra.mxu1 %v290_v12  ;;  %663 = vmatpush.msra.mxu3 %v290_v12 }
  0xae   : > { %356 = vmatpush.msra.mxu1 %v287_v10  ;;  %664 = vmatpush.msra.mxu3 %v287_v10 }
  0xaf   : > { %625 = vmatmul.msk.f32.vlgmr.msra.gmra.mxu3 %vm245_vm0, %v324_v13  ;;  %623 = vmatmul.msk.f32.vlgmr.msra.gmra.mxu1 %vm245_vm0, %v322_v14 }
  0xb1   : > { %v308_v15 = vpop.f32.mrf.mxu2 }
  0xb2   : > { %465 = vmatpush.msrb.mxu1 %v308_v15 }
  0xb3   : > { %v293_v16 = vpop.f32.mrf.mxu0 }
  0xb4   : > { %466 = vmatpush.msrb.mxu1 %v305_v11 }
  0xb7   : > { %626 = vmatmul.msk.f32.gmra.mxu3 %vm245_vm0, %v325_v17  ;;  %624 = vmatmul.msk.f32.gmra.mxu1 %vm245_vm0, %v323_v18 }
  0xbb   : > { %v296_v19 = vpop.f32.mrf.mxu0 }
  0xbc   : > { %391 = vmatpush.msrb.mxu2 %v296_v19 }
  0xbe   : > { %392 = vmatpush.msrb.mxu2 %v293_v16 }
  0xbf   : > { %627 = vmatmul.msk.f32.vlgmr.msrb.gmra.mxu2 %vm245_vm0, %v322_v14  ;;  %643 = vmatmul.msk.f32.vlgmr.msrb.gmra.mxu1 %vm245_vm0, %v322_v14 }
  0xc3   : > { %v299_v20 = vpop.f32.mrf.mxu0 }
  0xc7   : > { %628 = vmatmul.msk.f32.gmra.mxu2 %vm245_vm0, %v323_v18  ;;  %644 = vmatmul.msk.f32.gmra.mxu1 %vm245_vm0, %v323_v18 }
  0xcb   : > { %v302_v21 = vpop.f32.mrf.mxu0 }
  0xcc   : > { %428 = vmatpush.msrb.mxu3 %v302_v21 }
  0xce   : > { %429 = vmatpush.msrb.mxu3 %v299_v20 }
  0xcf   : > { %635 = vmatmul.msk.f32.vlgmr.msrb.gmra.mxu3 %vm245_vm0, %v322_v14  ;;  %629 = vmatmul.msk.f32.gmra.mxu2 %vm245_vm0, %v324_v13 }
  0xd0   : > { %645 = vmatmul.msk.f32.gmra.mxu1 %vm245_vm0, %v324_v13 }
  0xd7   : > { %636 = vmatmul.msk.f32.gmra.mxu3 %vm245_vm0, %v323_v18  ;;  %630 = vmatmul.msk.f32.gmra.mxu2 %vm245_vm0, %v325_v17 }
  0xd8   : > { %646 = vmatmul.msk.f32.gmra.mxu1 %vm245_vm0, %v325_v17 }
  0xdf   : > { %637 = vmatmul.msk.f32.gmra.mxu3 %vm245_vm0, %v324_v13 }
  0xe7   : > { %638 = vmatmul.msk.f32.gmra.mxu3 %vm245_vm0, %v325_v17 }
 0x12c   : > { %v358_v22 = vpop.f32.mrf.mxu1 }
 0x12d   : > { %370 = vst [vmem:[%s994_s21] sm:$0xff] %v358_v22 }
 0x132   : > { %v364_v23 = vpop.f32.mrf.mxu3 }
 0x133   : > { %372 = vst [vmem:[%s994_s21 + $0x10] sm:$0xff] %v364_v23 }
 0x134   : > { %v361_v24 = vpop.f32.mrf.mxu1 }
 0x135   : > { %371 = vst [vmem:[%s994_s21 + $0x8] sm:$0xff] %v361_v24 }
 0x13a   : > { %v367_v25 = vpop.f32.mrf.mxu3 }
 0x13b   : > { %373 = vst [vmem:[%s994_s21 + $0x18] sm:$0xff] %v367_v25 }
 0x13c   : > { %v468_v26 = vpop.f32.mrf.mxu1 }
 0x13d   : > { %647 = vst [vmem:[%s994_s21 + $0x60] sm:$0xff] %v468_v26 }
 0x142   : > { %v394_v27 = vpop.f32.mrf.mxu2 }
 0x143   : > { %631 = vst [vmem:[%s994_s21 + $0x20] sm:$0xff] %v394_v27 }
 0x144   : > { %v471_v28 = vpop.f32.mrf.mxu1 }
 0x145   : > { %648 = vst [vmem:[%s994_s21 + $0x68] sm:$0xff] %v471_v28 }
 0x14a   : > { %v397_v29 = vpop.f32.mrf.mxu2 }
 0x14b   : > { %632 = vst [vmem:[%s994_s21 + $0x28] sm:$0xff] %v397_v29 }
 0x14d   : > { %v474_v30 = vpop.f32.mrf.mxu1 }
 0x14e   : > { %649 = vst [vmem:[%s994_s21 + $0x70] sm:$0xff] %v474_v30 }
 0x152   : > { %v431_v31 = vpop.f32.mrf.mxu3  ;;  %v400_v32 = vpop.f32.mrf.mxu2 }
 0x153   : > { %639 = vst [vmem:[%s994_s21 + $0x40] sm:$0xff] %v431_v31 }
 0x154   : > { %633 = vst [vmem:[%s994_s21 + $0x30] sm:$0xff] %v400_v32 }
 0x155   : > { %v477_v33 = vpop.f32.mrf.mxu1 }
 0x156   : > { %650 = vst [vmem:[%s994_s21 + $0x78] sm:$0xff] %v477_v33 }
 0x15a   : > { %v434_v34 = vpop.f32.mrf.mxu3  ;;  %v403_v35 = vpop.f32.mrf.mxu2 }
 0x15b   : > { %640 = vst [vmem:[%s994_s21 + $0x48] sm:$0xff] %v434_v34 }
 0x15c   : > { %634 = vst [vmem:[%s994_s21 + $0x38] sm:$0xff] %v403_v35 }
 0x162   : > { %v437_v36 = vpop.f32.mrf.mxu3 }
 0x163   : > { %641 = vst [vmem:[%s994_s21 + $0x50] sm:$0xff] %v437_v36 }
 0x16a   : > { %v440_v37 = vpop.f32.mrf.mxu3 }
 0x16b   : > { %642 = vst [vmem:[%s994_s21 + $0x58] sm:$0xff] %v440_v37 }
 0x16c   : > { %788 = shalt.err (!%p785_p13)
}
 0x16d   : > { %s847_s19 = smov 128   ;;  %s848_s11 = smov 8  }
 0x16e   : > { %667 = dma.vmem_to_hbm [thread:$0]  (%p920_p9), %s502_s30, 2048, %s504_s4, %s486_s24, %s847_s19, %s847_s19, %s848_s11  }
 0x16f PF: > { %s518_s18 = sand.u32 1, %s823_s12   ;;  %p674_p0 = pnand %p607_p12, %p927_p11 }
 0x170   : > { %s519_s21 = scalar_lea.sflag [#allocation5], %s518_s18 }
 0x171   : > { %p675_p1 = pneg %p674_p0 }
 0x173   : > { %818 = dma.done.wait (%p675_p1), %s519_s21, 2048  }
 0x174   : > { %820 = vsyncadd (%p675_p1), %s519_s21, 4294965248  ;;  %s19_s17 = sadd.s32 1, %s843_s17   ;;  %s1059_s12 = smov %s827_s13 }
 0x175   : > { %p16_p2 = scmp.ge.s32.totalorder %s19_s17, 4   ;;  %s1060_s13 = smov %s831_s14 }
 0x176   : > { %s1061_s14 = smov %s925_s26  ;;  %s1062_s15 = smov %s839_s16 }
 0x177   : > { %s1063_s16 = smov %s1065_s20  ;;  %18 = sbr.rel (!%p16_p2) target bundleno = 6 (0x6), region = 93 }
 0x17c   :  { %525 = vsyncpa [#allocation4], 1 }
 0x17d   :  { %527 = vsyncpa [#allocation4 + $0x1], 1 }
 0x17e   :  { %528 = vsyncpa [#allocation5], 1 }
 0x17f   :  { %530 = vsyncpa [#allocation5 + $0x1], 1 }

</bundles_post_ra>
